<compile_context>
chip_gen: v5e
topology: v5e:2x2
jax: 0.10.0
libtpu: 0.0.40
codegen_flags: <defaults>
</compile_context>

<pallas_src>
import math
from functools import partial

import jax
import jax.numpy as jnp
from jax.experimental import pallas as pl
from jax.experimental.pallas import tpu as pltpu


# ---------------------------------------------------------------------------
# Kernel
# ---------------------------------------------------------------------------
def _seq_transform_kernel(x_ref, s1_ref, b1_ref, s2_ref, b2_ref,
                          y_ref, logl_ref, *, reps):
    """One row-tile of the fused affine -> tanh -> affine chain.

    x_ref:               (TILE_R, Dk)  input rows
    s1/b1/s2/b2 refs:    (pk, Dk)      per-feature params (pk == 1 or pack k)
    y_ref:               (TILE_R, Dk)  output rows
    logl_ref:            (TILE_R, 1)   per-row tanh log-det (affine log-dets
                                       are constant and added in the wrapper)
    reps (static):       sublane replication factor so params cover TILE_R rows
    """
    def expand(p_ref):
        p = p_ref[...]
        return jnp.tile(p, (reps, 1)) if reps > 1 else p

    x = x_ref[...]                                  # (TILE_R, Dk) f32
    s1 = expand(s1_ref)
    b1 = expand(b1_ref)
    s2 = expand(s2_ref)
    b2 = expand(b2_ref)

    h1 = x * s1 + b1                                # affine 1
    t = jnp.tanh(h1)                                # tanh (EUP)
    y_ref[...] = (t * s2 + b2).astype(y_ref.dtype)  # affine 2

    # per-element log|d tanh/dh| summed over the feature (lane) axis
    ld2 = jnp.log1p(-t * t)
    logl_ref[...] = jnp.sum(ld2, axis=-1, keepdims=True).astype(logl_ref.dtype)


# ---------------------------------------------------------------------------
# Tiling helpers
# ---------------------------------------------------------------------------
def _pick_pack_factor(batch, d):
    """Pack (B, D) -> (B*k, D//k) so sublanes are filled for tiny batches.

    k must divide D//128 so the packed lane width stays a multiple of 128.
    """
    if batch >= 8 or d % 128 != 0:
        return 1
    max_k = d // 128
    target = -(-8 // batch)                 # ceil(8 / batch)
    best = 1
    for cand in range(1, max_k + 1):
        if max_k % cand == 0:
            best = cand
            if cand >= target:
                break
    return best


def _pick_tile_rows(rows, cols, pack):
    """Largest row tile keeping a f32 block <= ~2 MiB; multiple of 8 and `pack`."""
    target_block_bytes = 2 * 1024 * 1024
    budget = max(1, target_block_bytes // (cols * 4))
    if budget >= rows:
        return rows                          # single block covers all rows
    step = math.lcm(8, pack)
    tile = (budget // step) * step
    return tile if tile > 0 else rows


# ---------------------------------------------------------------------------
# Wrapper
# ---------------------------------------------------------------------------
def sequential_transform_forward(x_nchw, s1, b1, s2, b2):
    """x_nchw: (B, C, H, W) float32.  Params: (1, D) with D = C*H*W.
    Returns (y_nchw, logL) where logL has shape (B,)."""
    B, C, H, W = x_nchw.shape
    D = C * H * W

    # Hoisted batch-independent affine log-dets (computed once, outside kernel).
    const_logdet = jnp.sum(jnp.log(jnp.abs(s1))) + jnp.sum(jnp.log(jnp.abs(s2)))

    # Small-batch packing: (B, D) -> (R, Dk) with R = B*k, Dk = D//k.
    k = _pick_pack_factor(B, D)
    Dk = D // k
    R = B * k

    x_p = x_nchw.reshape(R, Dk)
    s1_p = s1.reshape(k, Dk)
    b1_p = b1.reshape(k, Dk)
    s2_p = s2.reshape(k, Dk)
    b2_p = b2.reshape(k, Dk)

    tile_r = _pick_tile_rows(R, Dk, k)
    reps = (tile_r // k) if k > 1 else 1
    grid = (pl.cdiv(R, tile_r),)

    kernel = partial(_seq_transform_kernel, reps=reps)

    param_spec = pl.BlockSpec((k, Dk), lambda i: (0, 0))
    y_p, logl_rows = pl.pallas_call(
        kernel,
        out_shape=(
            jax.ShapeDtypeStruct((R, Dk), jnp.float32),
            jax.ShapeDtypeStruct((R, 1), jnp.float32),
        ),
        grid=grid,
        in_specs=[
            pl.BlockSpec((tile_r, Dk), lambda i: (i, 0)),   # x rows
            param_spec,                                     # s1
            param_spec,                                     # b1
            param_spec,                                     # s2
            param_spec,                                     # b2
        ],
        out_specs=(
            pl.BlockSpec((tile_r, Dk), lambda i: (i, 0)),   # y rows (lane-dense)
            pl.BlockSpec((tile_r, 1), lambda i: (i, 0)),    # per-row logL
        ),
        compiler_params=pltpu.CompilerParams(
            dimension_semantics=("parallel",),              # v7x: shard across TCs
            vmem_limit_bytes=32 * 1024 * 1024,
        ),
    )(x_p, s1_p, b1_p, s2_p, b2_p)

    y = y_p.reshape(B, C, H, W)
    logl = logl_rows.reshape(B, k).sum(axis=-1) + const_logdet
    return y, logl


# ---------------------------------------------------------------------------
# Pure-JAX reference mirroring SequentialTransform.forward semantics
# ---------------------------------------------------------------------------
def _reference_forward(x_nchw, s1, b1, s2, b2):
    B = x_nchw.shape[0]
    D = s1.shape[1]
    x = x_nchw.reshape(B, D)
    logL = jnp.zeros((B,), jnp.float32)

    h = x * s1 + b1
    logL = logL + jnp.sum(jnp.log(jnp.abs(s1))) * jnp.ones((B,))
    t = jnp.tanh(h)
    logL = logL + jnp.sum(jnp.log1p(-t * t), axis=-1)
    y = t * s2 + b2
    logL = logL + jnp.sum(jnp.log(jnp.abs(s2))) * jnp.ones((B,))
    return y.reshape(x_nchw.shape), logL


if __name__ == "__main__":
    key = jax.random.PRNGKey(0)
    kx, k1, k2, k3, k4 = jax.random.split(key, 5)

    B, C, H, W = 2, 4, 16, 16
    D = C * H * W

    x = jax.random.normal(kx, (B, C, H, W), dtype=jnp.float32)

    # Deterministic synthetic parameters (positive scales, small shifts).
    s1 = 0.5 + 0.5 * jax.random.uniform(k1, (1, D), dtype=jnp.float32)
    b1 = 0.1 * jax.random.normal(k2, (1, D), dtype=jnp.float32)
    s2 = 0.5 + 0.5 * jax.random.uniform(k3, (1, D), dtype=jnp.float32)
    b2 = 0.1 * jax.random.normal(k4, (1, D), dtype=jnp.float32)

    y, logL = sequential_transform_forward(x, s1, b1, s2, b2)
    jax.block_until_ready((y, logL))

    y_ref, logL_ref = _reference_forward(x, s1, b1, s2, b2)
    assert y.shape == (B, C, H, W) and logL.shape == (B,)
    assert jnp.allclose(y, y_ref, atol=1e-5, rtol=1e-5)
    assert jnp.allclose(logL, logL_ref, atol=1e-3, rtol=1e-5)

    print("KERNEL_OK")
</pallas_src>

<mosaic_0001>
module attributes {stable_mosaic.version = 11 : i64} {
  func.func @_seq_transform_kernel(%arg0: i32, %arg1: memref<8x256xf32, #tpu.memory_space<vmem>>, %arg2: memref<4x256xf32, #tpu.memory_space<vmem>>, %arg3: memref<4x256xf32, #tpu.memory_space<vmem>>, %arg4: memref<4x256xf32, #tpu.memory_space<vmem>>, %arg5: memref<4x256xf32, #tpu.memory_space<vmem>>, %arg6: memref<8x256xf32, #tpu.memory_space<vmem>>, %arg7: memref<8x1xf32, #tpu.memory_space<vmem>>) attributes {dimension_semantics = [#tpu.dimension_semantics<parallel>], iteration_bounds = array<i64: 1>, scalar_prefetch = 0 : i64, scratch_operands = 0 : i64, tpu.core_type = #tpu.core_type<tc>, window_params = [{transform_indices = @transform_0, window_bounds = array<i64: 8, 256>}, {pipeline_mode = #tpu.pipeline_mode<synchronous>, transform_indices = @transform_1, window_bounds = array<i64: 4, 256>}, {pipeline_mode = #tpu.pipeline_mode<synchronous>, transform_indices = @transform_2, window_bounds = array<i64: 4, 256>}, {pipeline_mode = #tpu.pipeline_mode<synchronous>, transform_indices = @transform_3, window_bounds = array<i64: 4, 256>}, {pipeline_mode = #tpu.pipeline_mode<synchronous>, transform_indices = @transform_4, window_bounds = array<i64: 4, 256>}, {transform_indices = @transform_5, window_bounds = array<i64: 8, 256>}, {transform_indices = @transform_6, window_bounds = array<i64: 8, 1>}]} {
    %c0 = arith.constant 0 : index
    %c0_0 = arith.constant 0 : index
    %0 = vector.load %arg1[%c0, %c0_0] : memref<8x256xf32, #tpu.memory_space<vmem>>, vector<8x256xf32>
    %c0_1 = arith.constant 0 : index
    %c0_2 = arith.constant 0 : index
    %1 = vector.load %arg2[%c0_1, %c0_2] : memref<4x256xf32, #tpu.memory_space<vmem>>, vector<4x256xf32>
    %2 = tpu.concatenate %1, %1 in 0 : vector<4x256xf32>, vector<4x256xf32> -> vector<8x256xf32>
    %c0_3 = arith.constant 0 : index
    %c0_4 = arith.constant 0 : index
    %3 = vector.load %arg3[%c0_3, %c0_4] : memref<4x256xf32, #tpu.memory_space<vmem>>, vector<4x256xf32>
    %4 = tpu.concatenate %3, %3 in 0 : vector<4x256xf32>, vector<4x256xf32> -> vector<8x256xf32>
    %c0_5 = arith.constant 0 : index
    %c0_6 = arith.constant 0 : index
    %5 = vector.load %arg4[%c0_5, %c0_6] : memref<4x256xf32, #tpu.memory_space<vmem>>, vector<4x256xf32>
    %6 = tpu.concatenate %5, %5 in 0 : vector<4x256xf32>, vector<4x256xf32> -> vector<8x256xf32>
    %c0_7 = arith.constant 0 : index
    %c0_8 = arith.constant 0 : index
    %7 = vector.load %arg5[%c0_7, %c0_8] : memref<4x256xf32, #tpu.memory_space<vmem>>, vector<4x256xf32>
    %8 = tpu.concatenate %7, %7 in 0 : vector<4x256xf32>, vector<4x256xf32> -> vector<8x256xf32>
    %9 = arith.mulf %0, %2 : vector<8x256xf32>
    %10 = arith.addf %9, %4 : vector<8x256xf32>
    %11 = math.tanh %10 : vector<8x256xf32>
    %12 = arith.mulf %11, %6 : vector<8x256xf32>
    %13 = arith.addf %12, %8 : vector<8x256xf32>
    %c0_9 = arith.constant 0 : index
    %c0_10 = arith.constant 0 : index
    %14 = vector.load %arg6[%c0_9, %c0_10] : memref<8x256xf32, #tpu.memory_space<vmem>>, vector<8x256xf32>
    tpu.vector_store %arg6[%c0_9, %c0_10], %13 {strides = array<i32>} : memref<8x256xf32, #tpu.memory_space<vmem>>, vector<8x256xf32>,
    %cst = arith.constant 0.000000e+00 : f32
    %15 = vector.broadcast %cst : f32 to vector<8x256xf32>
    %16 = arith.subf %15, %11 : vector<8x256xf32>
    %17 = arith.mulf %16, %11 : vector<8x256xf32>
    %18 = math.log1p %17 : vector<8x256xf32>
    %cst_11 = arith.constant dense<0.000000e+00> : vector<8xf32>
    %19 = vector.multi_reduction <add>, %18, %cst_11 [1] : vector<8x256xf32> to vector<8xf32>
    %20 = vector.shape_cast %19 : vector<8xf32> to vector<8x1xf32>
    %c0_12 = arith.constant 0 : index
    %c0_13 = arith.constant 0 : index
    %21 = vector.load %arg7[%c0_12, %c0_13] : memref<8x1xf32, #tpu.memory_space<vmem>>, vector<8x1xf32>
    tpu.vector_store %arg7[%c0_12, %c0_13], %20 {strides = array<i32>} : memref<8x1xf32, #tpu.memory_space<vmem>>, vector<8x1xf32>,
    return
  }
  func.func @transform_0(%arg0: i32) -> (i32, i32) {
    %c0_i32 = arith.constant 0 : i32
    %c0_i32_0 = arith.constant 0 : i32
    return %arg0, %c0_i32 : i32, i32
  }
  func.func @transform_1(%arg0: i32) -> (i32, i32) {
    %c0_i32 = arith.constant 0 : i32
    %c0_i32_0 = arith.constant 0 : i32
    %c0_i32_1 = arith.constant 0 : i32
    return %c0_i32, %c0_i32_0 : i32, i32
  }
  func.func @transform_2(%arg0: i32) -> (i32, i32) {
    %c0_i32 = arith.constant 0 : i32
    %c0_i32_0 = arith.constant 0 : i32
    %c0_i32_1 = arith.constant 0 : i32
    return %c0_i32, %c0_i32_0 : i32, i32
  }
  func.func @transform_3(%arg0: i32) -> (i32, i32) {
    %c0_i32 = arith.constant 0 : i32
    %c0_i32_0 = arith.constant 0 : i32
    %c0_i32_1 = arith.constant 0 : i32
    return %c0_i32, %c0_i32_0 : i32, i32
  }
  func.func @transform_4(%arg0: i32) -> (i32, i32) {
    %c0_i32 = arith.constant 0 : i32
    %c0_i32_0 = arith.constant 0 : i32
    %c0_i32_1 = arith.constant 0 : i32
    return %c0_i32, %c0_i32_0 : i32, i32
  }
  func.func @transform_5(%arg0: i32) -> (i32, i32) {
    %c0_i32 = arith.constant 0 : i32
    %c0_i32_0 = arith.constant 0 : i32
    return %arg0, %c0_i32 : i32, i32
  }
  func.func @transform_6(%arg0: i32) -> (i32, i32) {
    %c0_i32 = arith.constant 0 : i32
    %c0_i32_0 = arith.constant 0 : i32
    return %arg0, %c0_i32 : i32, i32
  }
}

</mosaic_0001>

<bundles_post_ra>
// kernel: tpu_custom_call.1
= control target key start
LH: loop header
LB: loop body
LE: loop exit
PB: predicated region body
PF: predicated region fallthrough
CT: control target
= control target key end

     0   :  { %12 = vsyncpa [#allocation3], 0  ;;  %s452_s0 = inlined_call_operand.hbm [shape: f32[8,256], index: 0, kind: input, shape index: {}]   ;;  %s453_s1 = inlined_call_operand.hbm [shape: f32[4,256], index: 1, kind: input, shape index: {}]   ;;  %s454_s2 = inlined_call_operand.hbm [shape: f32[4,256], index: 2, kind: input, shape index: {}]   ;;  %s455_s3 = inlined_call_operand.hbm [shape: f32[4,256], index: 3, kind: input, shape index: {}]   ;;  %s456_s4 = inlined_call_operand.hbm [shape: f32[4,256], index: 4, kind: input, shape index: {}]   ;;  %s457_s5 = inlined_call_operand.hbm [shape: f32[8,256], index: 5, kind: output, shape index: {0}]   ;;  %s458_s6 = inlined_call_operand.vmem [shape: f32[8,1], index: 6, kind: output, shape index: {1}]  }
   0x1   :  { %13 = vsyncpa [#allocation6], 0 }
   0x2   :  { %14 = vsyncpa [#allocation9], 0  ;;  %s32_s23 = sshll.u32 %s453_s1, 4  ;;  %s33_s23 = int_to_ptr.hbm [resolvable:$true] %s32_s23 }
   0x3   :  { %15 = vsyncpa [#allocation4], 0  ;;  %s382_s24 = smov [#allocation5]   ;;  %s54_s28 = sshll.u32 %s455_s3, 4  ;;  %s55_s28 = int_to_ptr.hbm [resolvable:$true] %s54_s28 }
   0x4   :  { %s34_s25 = sshll.u32 %s382_s24, 4  ;;  %s383_s29 = smov [#allocation8]   ;;  %s35_s25 = int_to_ptr.vmem [resolvable:$true] %s34_s25 }
   0x5   :  { %37 = dma.hbm_to_vmem [thread:$0]  %s33_s23, 128, %s35_s25, [#allocation6]  }
   0x6   :  { %s56_s30 = sshll.u32 %s383_s29, 4  ;;  %s21_s9 = sshll.u32 %s452_s0, 4  ;;  %s57_s30 = int_to_ptr.vmem [resolvable:$true] %s56_s30  ;;  %s22_s9 = int_to_ptr.hbm [resolvable:$true] %s21_s9 }
   0x7   :  { %59 = dma.hbm_to_vmem [thread:$0]  %s55_s28, 128, %s57_s30, [#allocation9]  }
   0x8   :  { %s43_s11 = sshll.u32 %s454_s2, 4  ;;  %s384_s12 = smov [#allocation2]   ;;  %s44_s11 = int_to_ptr.hbm [resolvable:$true] %s43_s11 }
   0x9   :  { %s23_s13 = sshll.u32 %s384_s12, 4  ;;  %s385_s3 = smov [#allocation7]   ;;  %s24_s13 = int_to_ptr.vmem [resolvable:$true] %s23_s13 }
   0xa   :  { %26 = dma.hbm_to_vmem [thread:$0]  %s22_s9, 256, %s24_s13, [#allocation3]  }
   0xb   :  { %s45_s14 = sshll.u32 %s385_s3, 4  ;;  %s65_s17 = sshll.u32 %s456_s4, 4  ;;  %s46_s14 = int_to_ptr.vmem [resolvable:$true] %s45_s14  ;;  %s66_s17 = int_to_ptr.hbm [resolvable:$true] %s65_s17 }
   0xc   :  { %48 = dma.hbm_to_vmem [thread:$0]  %s44_s11, 128, %s46_s14, [#allocation6]  }
   0xd   :  { %s386_s0 = smov [#allocation10]  }
   0xe   :  { %s67_s18 = sshll.u32 %s386_s0, 4  ;;  %s68_s18 = int_to_ptr.vmem [resolvable:$true] %s67_s18 }
   0xf   :  { %70 = dma.hbm_to_vmem [thread:$0]  %s66_s17, 128, %s68_s18, [#allocation9]  }
  0x10   :  { %374 = dma.done.wait [#allocation3], 256  }
  0x11   :  { %375 = vsyncadd [#allocation3], 4294967040 }
  0x12   :  { %376 = dma.done.wait [#allocation6], 256  }
  0x13   :  { %377 = vsyncadd [#allocation6], 4294967040 }
  0x14   :  { %378 = dma.done.wait [#allocation9], 256  }
  0x15   :  { %379 = vsyncadd [#allocation9], 4294967040  ;;  %v93_v0 = vld [vmem:[#allocation5] sm:$0xff]  ;;  %v109_v3 = vld [vmem:[#allocation7] sm:$0xff]  ;;  %vm106_vm0 = vcmask 1043456   ;;  %s387_s2 = smov [#allocation11]  }
  0x16   :  { %95 = vst [vmem:[#allocation1] ss:$2 sm:$0xff] %v93_v0  ;;  %v91_v8 = vld [vmem:[#allocation2] sm:$0xff]  ;;  %v92_v9 = vld [vmem:[#allocation2 + $0x8] sm:$0xff]  ;;  %s198_s4 = sshll.u32 %s387_s2, 4  ;;  %s200_s21 = sshll.u32 %s457_s5, 4  ;;  %s199_s4 = int_to_ptr.vmem [resolvable:$true] %s198_s4  ;;  %s201_s21 = int_to_ptr.hbm [resolvable:$true] %s200_s21 }
  0x17   :  { %v124_v43 = vld [vmem:[#allocation8] sm:$0xff]  ;;  %v139_v48 = vld [vmem:[#allocation10] sm:$0xff]  ;;  %vm191_vm3 = vcmask 7168  }
  0x1d   :  { %v96_v1 = vld.sshfl [vmem:[#allocation1] sm:$0xff pattern:$0x75316420]  ;;  %v97_v2 = vld.sshfl [vmem:[#allocation1 + $0x8] sm:$0xff pattern:$0x75316420] }
  0x1e   :  { %101 = vst [vmem:[#allocation1 + $0x1] ss:$2 sm:$0xff] %v93_v0 }
  0x25   :  { %v102_v4 = vld.sshfl [vmem:[#allocation1] sm:$0xff pattern:$0x75316420]  ;;  %v103_v5 = vld.sshfl [vmem:[#allocation1 + $0x8] sm:$0xff pattern:$0x75316420] }
  0x26   :  { %111 = vst [vmem:[#allocation1] ss:$2 sm:$0xff] %v109_v3  ;;  %v107_v10 = vsel %vm106_vm0, %v96_v1, %v102_v4  ;;  %v108_v11 = vsel %vm106_vm0, %v97_v2, %v103_v5 }
  0x27   :  { %v154_v12 = vmul.f32 %v107_v10, %v91_v8  ;;  %v155_v13 = vmul.f32 %v108_v11, %v92_v9 }
  0x2d   :  { %v112_v6 = vld.sshfl [vmem:[#allocation1] sm:$0xff pattern:$0x75316420]  ;;  %v113_v7 = vld.sshfl [vmem:[#allocation1 + $0x8] sm:$0xff pattern:$0x75316420] }
  0x2e   :  { %117 = vst [vmem:[#allocation1 + $0x1] ss:$2 sm:$0xff] %v109_v3 }
  0x35   :  { %v118_v14 = vld.sshfl [vmem:[#allocation1] sm:$0xff pattern:$0x75316420]  ;;  %v119_v15 = vld.sshfl [vmem:[#allocation1 + $0x8] sm:$0xff pattern:$0x75316420] }
  0x36   :  { %v122_v16 = vsel %vm106_vm0, %v112_v6, %v118_v14  ;;  %v123_v17 = vsel %vm106_vm0, %v113_v7, %v119_v15  ;;  %126 = vst [vmem:[#allocation1] ss:$2 sm:$0xff] %v124_v43 }
  0x37   :  { %v156_v18 = vadd.f32 %v154_v12, %v122_v16  ;;  %v157_v19 = vadd.f32 %v155_v13, %v123_v17 }
  0x39   :  { %222 = vtanh.f32 %v156_v18 }
  0x3a   :  { %224 = vtanh.f32 %v157_v19 }
  0x3d   :  { %v127_v44 = vld.sshfl [vmem:[#allocation1] sm:$0xff pattern:$0x75316420]  ;;  %v128_v45 = vld.sshfl [vmem:[#allocation1 + $0x8] sm:$0xff pattern:$0x75316420] }
  0x3e   :  { %132 = vst [vmem:[#allocation1 + $0x1] ss:$2 sm:$0xff] %v124_v43 }
  0x3f   :  { %v223_v20 = vpop.eup %222 }
  0x40   :  { %v225_v21 = vpop.eup %224  ;;  %v166_v22 = vsub.f32 0.0, %v223_v20 }
  0x41   :  { %v167_v23 = vsub.f32 0.0, %v225_v21 }
  0x42   :  { %v168_v24 = vmul.f32 %v223_v20, %v166_v22 }
  0x43   :  { %v169_v25 = vmul.f32 %v225_v21, %v167_v23 }
  0x44   :  { %v170_v26 = vadd.f32 1.0, %v168_v24  ;;  %v173_v27 = vmul.f32 -0.5, %v168_v24  ;;  %v176_v31 = vand.u32 2147483647, %v168_v24 }
  0x45   :  { %v179_v28 = vadd.f32 1.0, %v169_v25  ;;  %v182_v29 = vmul.f32 -0.5, %v169_v25  ;;  %v185_v33 = vand.u32 2147483647, %v169_v25 }
  0x46   :  { %226 = vlog2.f32 %v170_v26  ;;  %v174_v30 = vadd.f32 1.0, %v173_v27  ;;  %vm177_vm1 = vcmp.lt.f32.partialorder %v176_v31, 0.0004427343  ;;  %v133_v46 = vld.sshfl [vmem:[#allocation1] sm:$0xff pattern:$0x75316420] }
  0x47   :  { %228 = vlog2.f32 %v179_v28  ;;  %v183_v32 = vadd.f32 1.0, %v182_v29  ;;  %vm186_vm2 = vcmp.lt.f32.partialorder %v185_v33, 0.0004427343  ;;  %v134_v47 = vld.sshfl [vmem:[#allocation1 + $0x8] sm:$0xff pattern:$0x75316420]  ;;  %v137_v51 = vsel %vm106_vm0, %v127_v44, %v133_v46 }
  0x48   :  { %v175_v34 = vmul.f32 %v174_v30, %v168_v24  ;;  %141 = vst [vmem:[#allocation1] ss:$2 sm:$0xff] %v139_v48  ;;  %v138_v52 = vsel %vm106_vm0, %v128_v45, %v134_v47  ;;  %v160_v53 = vmul.f32 %v223_v20, %v137_v51 }
  0x49   :  { %v184_v36 = vmul.f32 %v183_v32, %v169_v25  ;;  %v161_v54 = vmul.f32 %v225_v21, %v138_v52 }
  0x4c   :  { %v227_v35 = vpop.eup %226 }
  0x4d   :  { %v229_v37 = vpop.eup %228  ;;  %v172_v38 = vmul.f32 0.6931472, %v227_v35 }
  0x4e   :  { %v181_v39 = vmul.f32 0.6931472, %v229_v37 }
  0x4f   :  { %v178_v40 = vsel %vm177_vm1, %v175_v34, %v172_v38  ;;  %v142_v49 = vld.sshfl [vmem:[#allocation1] sm:$0xff pattern:$0x75316420]  ;;  %v143_v50 = vld.sshfl [vmem:[#allocation1 + $0x8] sm:$0xff pattern:$0x75316420] }
  0x50   :  { %v187_v41 = vsel %vm186_vm2, %v184_v36, %v181_v39  ;;  %147 = vst [vmem:[#allocation1 + $0x1] ss:$2 sm:$0xff] %v139_v48 }
  0x51   :  { %v188_v42 = vadd.f32 %v187_v41, %v178_v40 }
  0x53   :  { %189 = vadd.xlane.f32.xlu0 %v188_v42 }
  0x57   :  { %v148_v55 = vld.sshfl [vmem:[#allocation1] sm:$0xff pattern:$0x75316420]  ;;  %v149_v56 = vld.sshfl [vmem:[#allocation1 + $0x8] sm:$0xff pattern:$0x75316420] }
  0x58   :  { %v152_v57 = vsel %vm106_vm0, %v142_v49, %v148_v55  ;;  %v153_v58 = vsel %vm106_vm0, %v143_v50, %v149_v56 }
  0x59   :  { %v162_v59 = vadd.f32 %v160_v53, %v152_v57  ;;  %v163_v60 = vadd.f32 %v161_v54, %v153_v58 }
  0x5b   :  { %164 = vst [vmem:[#allocation11] sm:$0xff] %v162_v59 }
  0x5c   :  { %165 = vst [vmem:[#allocation11 + $0x8] sm:$0xff] %v163_v60 }
  0x5d   :  { %203 = dma.vmem_to_hbm [thread:$0]  %s199_s4, 256, %s201_s21, [#allocation4]  }
  0xc6   :  { %v190_v61 = vpop.xlane.xlu0 %189 }
  0xc7   :  { %192 = vst.msk [vmem:[%s458_s6] sm:$0xff] %vm191_vm3, %v190_v61 }
  0xc8   :  { %380 = dma.done.wait [#allocation4], 256  }
  0xc9   :  { %381 = vsyncadd [#allocation4], 4294967040 }
  0xca   :  { %212 = vsyncpa [#allocation3], 1 }
  0xcb   :  { %213 = vsyncpa [#allocation6], 1 }
  0xcc   :  { %214 = vsyncpa [#allocation9], 1 }
  0xcd   :  { %215 = vsyncpa [#allocation4], 1 }

</bundles_post_ra>
